<compile_context>
chip_gen: v6e
topology: v6e:2x2x1
jax: 0.10.0
libtpu: 0.0.40
codegen_flags: <defaults>
</compile_context>

<pallas_src>
import functools
import math

import jax
import jax.numpy as jnp
from jax import lax
from jax.experimental import pallas as pl
from jax.experimental.pallas import tpu as pltpu


# ----------------------------------------------------------------------------
# Kernels
# ----------------------------------------------------------------------------
def _posenc_eval_kernel(x_ref, pe_ref, o_ref):
    # x_ref: (TS, B, D); pe_ref: (TS, 1, D) -> broadcast add over the batch axis.
    o_ref[...] = (x_ref[...] + pe_ref[...]).astype(o_ref.dtype)


def _posenc_dropout_kernel(seed_ref, x_ref, pe_ref, o_ref, *, threshold, scale):
    # Training mode: (x + pe) followed by inverted dropout, keep prob = 1 - p.
    y = (x_ref[...] + pe_ref[...]).astype(jnp.float32)

    ts, b, d = x_ref.shape
    shape = (ts, b, d)
    s_idx = lax.broadcasted_iota(jnp.int32, shape, 0)
    b_idx = lax.broadcasted_iota(jnp.int32, shape, 1)
    d_idx = lax.broadcasted_iota(jnp.int32, shape, 2)

    # Global element index -> mask is identical regardless of tile size / grid.
    row = pl.program_id(0) * ts + s_idx              # global sequence position
    lin = (row * b + b_idx) * d + d_idx              # global linear index (wraps ok)

    # Mix the seed (scalar int32 math wraps), then hash in uint32 on vectors.
    mixed = lin + seed_ref[0] * jnp.int32(-1640531527)   # 0x9E3779B9 as signed
    z = mixed.astype(jnp.uint32)
    # lowbias32 finalizer -> well-distributed uint32 per element.
    z = z ^ (z >> jnp.uint32(16))
    z = z * jnp.uint32(0x7FEB352D)
    z = z ^ (z >> jnp.uint32(15))
    z = z * jnp.uint32(0x846CA68B)
    z = z ^ (z >> jnp.uint32(16))

    keep = z >= jnp.uint32(threshold)                # P(keep) = 1 - p
    out = jnp.where(keep, y * jnp.float32(scale), jnp.float32(0.0))
    o_ref[...] = out.astype(o_ref.dtype)


# ----------------------------------------------------------------------------
# Parameter / buffer setup (mirrors nn.Module.__init__)
# ----------------------------------------------------------------------------
def make_pe(d_model: int, max_len: int = 5000, dtype=jnp.float32):
    position = jnp.arange(max_len, dtype=jnp.float32)[:, None]              # [L, 1]
    div_term = jnp.exp(
        jnp.arange(0, d_model, 2, dtype=jnp.float32) * (-math.log(10000.0) / d_model)
    )                                                                        # [D/2]
    ang = position * div_term                                                # [L, D/2]
    pe = jnp.zeros((max_len, 1, d_model), dtype=jnp.float32)
    pe = pe.at[:, 0, 0::2].set(jnp.sin(ang))
    pe = pe.at[:, 0, 1::2].set(jnp.cos(ang))
    return pe.astype(dtype)


# ----------------------------------------------------------------------------
# Wrapper
# ----------------------------------------------------------------------------
def _choose_row_tile(S, B, D, itemsize, budget_bytes=16 * 1024 * 1024):
    # VMEM per sequence-row, one buffer copy: x row + out row + pe row
    # (pe's size-1 batch dim pads to 8 sublanes in VMEM).
    per_row = (2 * B + 8) * D * itemsize
    rows = budget_bytes // (2 * per_row)    # double-buffered by the pipeline
    return int(max(1, min(rows, S)))


def positional_encoding(x, pe, *, p: float = 0.1, training: bool = False,
                        seed: int = 0, max_rows: int | None = None):
    """x: [S, B, D]; pe: [max_len, 1, D].  Returns dropout(x + pe[:S])."""
    S, B, D = x.shape
    L = pe.shape[0]
    assert pe.shape == (L, 1, D) and S <= L

    TS = _choose_row_tile(S, B, D, jnp.dtype(x.dtype).itemsize)
    if max_rows is not None:
        TS = max(1, min(TS, max_rows))
    grid = (pl.cdiv(S, TS),)

    x_spec = pl.BlockSpec((TS, B, D), lambda i: (i, 0, 0))
    pe_spec = pl.BlockSpec((TS, 1, D), lambda i: (i, 0, 0))   # index full table
    o_spec = pl.BlockSpec((TS, B, D), lambda i: (i, 0, 0))
    out_shape = jax.ShapeDtypeStruct((S, B, D), x.dtype)

    compiler_params = pltpu.CompilerParams(
        dimension_semantics=("parallel",),        # shard tiles across TCs (v7x)
        vmem_limit_bytes=48 * 1024 * 1024,        # fits v7x's 64 MiB physical VMEM
    )

    if (not training) or p == 0.0:
        # Eval mode: dropout is identity.
        return pl.pallas_call(
            _posenc_eval_kernel,
            out_shape=out_shape,
            grid=grid,
            in_specs=[x_spec, pe_spec],
            out_specs=o_spec,
            compiler_params=compiler_params,
        )(x, pe)

    threshold = min(int(round(p * (2 ** 32))), 2 ** 32 - 1)
    scale = 1.0 / (1.0 - p)
    seed_arr = jnp.asarray([seed], dtype=jnp.int32)
    return pl.pallas_call(
        functools.partial(_posenc_dropout_kernel, threshold=threshold, scale=scale),
        out_shape=out_shape,
        grid=grid,
        in_specs=[
            pl.BlockSpec(memory_space=pltpu.MemorySpace.SMEM),   # seed scalar
            x_spec,
            pe_spec,
        ],
        out_specs=o_spec,
        compiler_params=compiler_params,
    )(seed_arr, x, pe)


# ----------------------------------------------------------------------------
# Demo / self-check
# ----------------------------------------------------------------------------
if __name__ == "__main__":
    S, B, D = 8, 2, 32          # seq=8, batch=2, d_model=32
    MAX_LEN = 64
    P = 0.1

    key = jax.random.PRNGKey(0)
    x = jax.random.normal(key, (S, B, D), dtype=jnp.float32)
    pe = make_pe(D, MAX_LEN)
    ref = x + pe[:S]

    # Eval mode (dropout = identity): single tile.
    out_eval = jax.block_until_ready(positional_encoding(x, pe, p=P, training=False))
    assert out_eval.shape == (S, B, D)
    assert jnp.allclose(out_eval, ref, atol=1e-6), "eval-mode mismatch"

    # Eval mode with a forced multi-tile grid must give the same result.
    out_eval_t = jax.block_until_ready(
        positional_encoding(x, pe, p=P, training=False, max_rows=4))
    assert jnp.allclose(out_eval_t, ref, atol=1e-6), "tiled eval mismatch"

    # Training mode: kept elements equal (x + pe) / (1 - p), dropped are exactly 0.
    out_tr = jax.block_until_ready(
        positional_encoding(x, pe, p=P, training=True, seed=1234))
    assert out_tr.shape == (S, B, D)
    scale = 1.0 / (1.0 - P)
    kept = out_tr != 0.0
    assert jnp.allclose(jnp.where(kept, out_tr, ref * scale), ref * scale,
                        atol=1e-5), "dropout scaling mismatch"

    # Dropout mask depends only on (seed, global index) -> tiling-invariant.
    out_tr_t = jax.block_until_ready(
        positional_encoding(x, pe, p=P, training=True, seed=1234, max_rows=4))
    assert jnp.allclose(out_tr, out_tr_t), "dropout mask not tiling-invariant"

    print("KERNEL_OK")
</pallas_src>

<mosaic_0001>
module attributes {stable_mosaic.version = 11 : i64} {
  func.func @_posenc_eval_kernel(%arg0: i32, %arg1: memref<8x2x32xf32, #tpu.memory_space<vmem>>, %arg2: memref<8x1x32xf32, #tpu.memory_space<vmem>>, %arg3: memref<8x2x32xf32, #tpu.memory_space<vmem>>) attributes {dimension_semantics = [#tpu.dimension_semantics<parallel>], iteration_bounds = array<i64: 1>, scalar_prefetch = 0 : i64, scratch_operands = 0 : i64, tpu.core_type = #tpu.core_type<tc>, window_params = [{transform_indices = @transform_0, window_bounds = array<i64: 8, 2, 32>}, {transform_indices = @transform_1, window_bounds = array<i64: 8, 1, 32>}, {transform_indices = @transform_2, window_bounds = array<i64: 8, 2, 32>}]} {
    %c0 = arith.constant 0 : index
    %c0_0 = arith.constant 0 : index
    %c0_1 = arith.constant 0 : index
    %0 = vector.load %arg1[%c0, %c0_0, %c0_1] : memref<8x2x32xf32, #tpu.memory_space<vmem>>, vector<8x2x32xf32>
    %c0_2 = arith.constant 0 : index
    %c0_3 = arith.constant 0 : index
    %c0_4 = arith.constant 0 : index
    %1 = vector.load %arg2[%c0_2, %c0_3, %c0_4] : memref<8x1x32xf32, #tpu.memory_space<vmem>>, vector<8x1x32xf32>
    %2 = vector.broadcast %1 : vector<8x1x32xf32> to vector<8x2x32xf32>
    %3 = arith.addf %0, %2 : vector<8x2x32xf32>
    %c0_5 = arith.constant 0 : index
    %c0_6 = arith.constant 0 : index
    %c0_7 = arith.constant 0 : index
    %4 = vector.load %arg3[%c0_5, %c0_6, %c0_7] : memref<8x2x32xf32, #tpu.memory_space<vmem>>, vector<8x2x32xf32>
    tpu.vector_store %arg3[%c0_5, %c0_6, %c0_7], %3 {strides = array<i32>} : memref<8x2x32xf32, #tpu.memory_space<vmem>>, vector<8x2x32xf32>,
    return
  }
  func.func @transform_0(%arg0: i32) -> (i32, i32, i32) {
    %c0_i32 = arith.constant 0 : i32
    %c0_i32_0 = arith.constant 0 : i32
    %c0_i32_1 = arith.constant 0 : i32
    return %arg0, %c0_i32, %c0_i32_0 : i32, i32, i32
  }
  func.func @transform_1(%arg0: i32) -> (i32, i32, i32) {
    %c0_i32 = arith.constant 0 : i32
    %c0_i32_0 = arith.constant 0 : i32
    %c0_i32_1 = arith.constant 0 : i32
    return %arg0, %c0_i32, %c0_i32_0 : i32, i32, i32
  }
  func.func @transform_2(%arg0: i32) -> (i32, i32, i32) {
    %c0_i32 = arith.constant 0 : i32
    %c0_i32_0 = arith.constant 0 : i32
    %c0_i32_1 = arith.constant 0 : i32
    return %arg0, %c0_i32, %c0_i32_0 : i32, i32, i32
  }
}

</mosaic_0001>

<bundles_post_ra>
// kernel: tpu_custom_call.1
= control target key start
LH: loop header
LB: loop body
LE: loop exit
PB: predicated region body
PF: predicated region fallthrough
CT: control target
= control target key end

     0   :  { %vm84_vm0 = vcmask 254976   ;;  %s219_s0 = inlined_call_operand.vmem [shape: f32[8,2,32], index: 0, kind: input, shape index: {}]   ;;  %s220_s1 = inlined_call_operand.vmem [shape: f32[64,1,32], index: 1, kind: input, shape index: {}]   ;;  %s221_s2 = inlined_call_operand.hbm [shape: f32[8,2,32], index: 2, kind: output, shape index: {}]  }
   0x1   :  { %v12_v0 = vld [vmem:[%s219_s0] sm:$0x3]  ;;  %v13_v3 = vld [vmem:[%s219_s0 + $0x2] sm:$0x3]  ;;  %v14_v5 = vld [vmem:[%s219_s0 + $0x4] sm:$0x3] }
   0x2   :  { %v109_v1 = vld [vmem:[%s220_s1] ss:$0 sm:$0xff]  ;;  %v110_v4 = vld [vmem:[%s220_s1 + $0x1] ss:$0 sm:$0xff]  ;;  %v111_v7 = vld [vmem:[%s220_s1 + $0x2] ss:$0 sm:$0xff] }
   0x3   :  { %v76_v2 = vadd.f32 %v109_v1, %v12_v0  ;;  %v77_v6 = vadd.f32 %v110_v4, %v13_v3  ;;  %v15_v8 = vld [vmem:[%s219_s0 + $0x6] sm:$0x3]  ;;  %v112_v9 = vld [vmem:[%s220_s1 + $0x3] ss:$0 sm:$0xff]  ;;  %v78_v10 = vadd.f32 %v111_v7, %v14_v5  ;;  %v16_v12 = vld [vmem:[%s219_s0 + $0x8] sm:$0x3] }
   0x4   :  { %v79_v11 = vadd.f32 %v112_v9, %v15_v8  ;;  %v113_v13 = vld [vmem:[%s220_s1 + $0x4] ss:$0 sm:$0xff]  ;;  %v17_v14 = vld [vmem:[%s219_s0 + $0xa] sm:$0x3]  ;;  %v114_v16 = vld [vmem:[%s220_s1 + $0x5] ss:$0 sm:$0xff] }
   0x5   :  { %85 = vst.msk [vmem:[#allocation2] sm:$0x3] %vm84_vm0, %v76_v2  ;;  %86 = vst.msk [vmem:[#allocation2 + $0x2] sm:$0x3] %vm84_vm0, %v77_v6  ;;  %v80_v15 = vadd.f32 %v113_v13, %v16_v12  ;;  %v18_v17 = vld [vmem:[%s219_s0 + $0xc] sm:$0x3]  ;;  %v81_v19 = vadd.f32 %v114_v16, %v17_v14 }
   0x6   :  { %v115_v18 = vld [vmem:[%s220_s1 + $0x6] ss:$0 sm:$0xff]  ;;  %87 = vst.msk [vmem:[#allocation2 + $0x4] sm:$0x3] %vm84_vm0, %v78_v10  ;;  %88 = vst.msk [vmem:[#allocation2 + $0x6] sm:$0x3] %vm84_vm0, %v79_v11 }
   0x7   :  { %v82_v20 = vadd.f32 %v115_v18, %v18_v17  ;;  %v19_v21 = vld [vmem:[%s219_s0 + $0xe] sm:$0x3]  ;;  %v116_v22 = vld [vmem:[%s220_s1 + $0x7] ss:$0 sm:$0xff] }
   0x8   :  { %7 = vsyncpa [#allocation3], 0  ;;  %89 = vst.msk [vmem:[#allocation2 + $0x8] sm:$0x3] %vm84_vm0, %v80_v15  ;;  %v83_v23 = vadd.f32 %v116_v22, %v19_v21  ;;  %s142_s13 = smov [#allocation2]  }
   0x9   :  { %s98_s14 = sshll.u32 %s142_s13, 4  ;;  %90 = vst.msk [vmem:[#allocation2 + $0xa] sm:$0x3] %vm84_vm0, %v81_v19  ;;  %91 = vst.msk [vmem:[#allocation2 + $0xc] sm:$0x3] %vm84_vm0, %v82_v20  ;;  %s99_s14 = int_to_ptr.vmem [resolvable:$true] %s98_s14 }
   0xa   :  { %92 = vst.msk [vmem:[#allocation2 + $0xe] sm:$0x3] %vm84_vm0, %v83_v23  ;;  %s120_s15 = scalar_lea.vmem %s99_s14, 256  ;;  %p125_p1 = scmp.lt.s32.totalorder %s99_s14, %s99_s14 }
   0xb   :  { %p121_p0 = scmp.ne.s32.totalorder %s99_s14, %s120_s15  ;;  %p126_p2 = scmp.lt.s32.totalorder %s120_s15, %s120_s15 }
   0xd   :  { %p127_p3 = por %p126_p2, %p125_p1 }
   0xf   :  { %p128_p4 = pnand %p127_p3, %p121_p0 }
  0x11   :  { %131 = shalt.err (!%p128_p4)
}
  0x12   :  { %s143_s0 = smov 32   ;;  %s144_s1 = smov 2  }
  0x13   :  { %104 = dma.vmem_to_hbm [thread:$0]  %s99_s14, 256, %s221_s2, [#allocation3], %s143_s0, %s143_s0, %s144_s1  }
  0x14   :  { %140 = dma.done.wait [#allocation3], 256  }
  0x15   :  { %141 = vsyncadd [#allocation3], 4294967040 }
  0x16   :  { %108 = vsyncpa [#allocation3], 1 }

</bundles_post_ra>
